<compile_context>
chip_gen: v6e
topology: v6e:2x2x1
jax: 0.10.0
libtpu: 0.0.40
codegen_flags: <defaults>
</compile_context>

<pallas_src>
import functools

import jax
import jax.numpy as jnp
from jax.experimental import pallas as pl
from jax.experimental.pallas import tpu as pltpu

OUT_PAD = 128      # lane-dense output width (>= action_space + 1)
ROW_ALIGN = 16     # bf16 sublane tile is (16, 128): keep slab segments 16-row aligned
MAX_TILE_B = 512   # batch tile: x/out double buffers + ~0.2 MiB slab stay far
                   # under the 32 MiB scoped VMEM default on all generations


def _round_up(n, m):
    return ((n + m - 1) // m) * m


# ----------------------------- Pallas kernel --------------------------------
def _policy_kernel(x_ref, w_ref, out_ref, *, s_pad, h, out_pad,
                   off_w1, off_b1, off_w2, off_b2, off_w3, off_b3):
    """One batch tile of the fused actor/critic MLP.

    x_ref  : [TB, S_pad]   bf16  (streamed per grid step)
    w_ref  : [rows, 2H]    bf16  packed slab (constant index_map -> VMEM resident)
    out_ref: [TB, OUT_PAD] f32   cols [0,A) = action_mean, col A = state_value
    """
    h2 = 2 * h
    x = x_ref[...]                                               # [TB, S_pad] bf16

    # fused fc1 (actor | critic): one [TB, 2H] matmul, f32 accumulation on MXU
    w1 = w_ref[off_w1:off_w1 + s_pad, :]
    b1 = w_ref[off_b1:off_b1 + 1, :].astype(jnp.float32)
    a1 = jnp.tanh(jnp.dot(x, w1, preferred_element_type=jnp.float32) + b1)
    a1 = a1.astype(jnp.bfloat16)                                 # feed MXU at bf16 rate

    # fused fc2 (block-diagonal [2H, 2H]): single pass on the 256-wide MXU.
    # TODO(synk): split into two 128x128 dots on v5e (128x128 MXU).
    w2 = w_ref[off_w2:off_w2 + h2, :]
    b2 = w_ref[off_b2:off_b2 + 1, :].astype(jnp.float32)
    a2 = jnp.tanh(jnp.dot(a1, w2, preferred_element_type=jnp.float32) + b2)
    a2 = a2.astype(jnp.bfloat16)

    # fc3: w3 stored as two [H, OUT_PAD] halves packed side-by-side in lanes.
    w3_top = w_ref[off_w3:off_w3 + h, 0:out_pad]                 # acts on actor half
    w3_bot = w_ref[off_w3:off_w3 + h, out_pad:2 * out_pad]       # acts on critic half
    b3 = w_ref[off_b3:off_b3 + 1, 0:out_pad].astype(jnp.float32)
    out_ref[...] = (jnp.dot(a2[:, :h], w3_top, preferred_element_type=jnp.float32)
                    + jnp.dot(a2[:, h:], w3_bot, preferred_element_type=jnp.float32)
                    + b3)


# --------------------------- parameter packing --------------------------------
def pack_policy_params(p):
    """Packs the 12 weight/bias tensors into one contiguous bf16 slab [rows, 2H]
    and precomputes sigma = softplus(sigma_param). Run once per parameter set."""
    S, H = p["w1a"].shape
    A = p["w3a"].shape[1]
    assert A + 1 <= OUT_PAD, "action_space + 1 must fit in the 128-lane output"
    assert OUT_PAD <= H, "packing assumes OUT_PAD <= hidden (hidden=128 in the module)"
    H2 = 2 * H
    S_pad = _round_up(S, ROW_ALIGN)

    off_w1 = 0
    off_b1 = off_w1 + S_pad
    off_w2 = off_b1 + ROW_ALIGN
    off_b2 = off_w2 + H2
    off_w3 = off_b2 + ROW_ALIGN
    off_b3 = off_w3 + H
    rows = off_b3 + ROW_ALIGN

    w1 = jnp.concatenate([p["w1a"], p["w1c"]], axis=1)                  # [S, 2H]
    b1 = jnp.concatenate([p["b1a"], p["b1c"]], axis=1)                  # [1, 2H]
    w2 = jnp.zeros((H2, H2), jnp.float32)
    w2 = w2.at[:H, :H].set(p["w2a"]).at[H:, H:].set(p["w2c"])           # block-diag
    b2 = jnp.concatenate([p["b2a"], p["b2c"]], axis=1)                  # [1, 2H]
    # fc3 packed as [H, 2*OUT_PAD]: left half multiplies the actor hidden half,
    # right half multiplies the critic hidden half.
    w3 = jnp.zeros((H, 2 * OUT_PAD), jnp.float32)
    w3 = w3.at[:, :A].set(p["w3a"])                                     # mean -> cols [0,A)
    w3 = w3.at[:, OUT_PAD + A:OUT_PAD + A + 1].set(p["w3c"])            # value -> col A
    b3 = jnp.zeros((1, H2), jnp.float32)
    b3 = b3.at[:, :A].set(p["b3a"]).at[:, A:A + 1].set(p["b3c"])

    slab = jnp.zeros((rows, H2), jnp.float32)
    slab = slab.at[off_w1:off_w1 + S, :].set(w1)
    slab = slab.at[off_b1:off_b1 + 1, :].set(b1)
    slab = slab.at[off_w2:off_w2 + H2, :].set(w2)
    slab = slab.at[off_b2:off_b2 + 1, :].set(b2)
    slab = slab.at[off_w3:off_w3 + H, :].set(w3)
    slab = slab.at[off_b3:off_b3 + 1, :].set(b3)
    slab = slab.astype(jnp.bfloat16)          # half the DMA bytes, native MXU dtype

    sigma = jax.nn.softplus(p["sigma"])       # x-independent: computed once here

    meta = dict(S=S, S_pad=S_pad, H=H, H2=H2, A=A, rows=rows,
                off_w1=off_w1, off_b1=off_b1, off_w2=off_w2,
                off_b2=off_b2, off_w3=off_w3, off_b3=off_b3)
    return {"slab": slab, "sigma": sigma, "meta": meta}


# ------------------------------ wrapper --------------------------------------
def policy_forward(x, packed):
    """Forward pass: returns (action_mean [B,A], sigma [1,A], state_value [B,1]).
    Normal(mean, sigma) sampling stays outside the kernel."""
    meta = packed["meta"]
    S, S_pad, H, H2, A, rows = (meta["S"], meta["S_pad"], meta["H"],
                                meta["H2"], meta["A"], meta["rows"])
    B = x.shape[0]

    tile_b = min(MAX_TILE_B, _round_up(B, ROW_ALIGN))
    b_pad = _round_up(B, tile_b)
    x = x.astype(jnp.bfloat16)
    if (b_pad, S_pad) != x.shape:
        x = jnp.pad(x, ((0, b_pad - B), (0, S_pad - S)))

    kernel = functools.partial(
        _policy_kernel, s_pad=S_pad, h=H, out_pad=OUT_PAD,
        off_w1=meta["off_w1"], off_b1=meta["off_b1"], off_w2=meta["off_w2"],
        off_b2=meta["off_b2"], off_w3=meta["off_w3"], off_b3=meta["off_b3"])

    flops = 2 * b_pad * (S_pad * H2 + H2 * H2 + H2 * OUT_PAD)
    bytes_accessed = (rows * H2 + b_pad * S_pad) * 2 + b_pad * OUT_PAD * 4

    out = pl.pallas_call(
        kernel,
        out_shape=jax.ShapeDtypeStruct((b_pad, OUT_PAD), jnp.float32),
        grid=(b_pad // tile_b,),
        in_specs=[
            pl.BlockSpec((tile_b, S_pad), lambda i: (i, 0)),   # x streams per tile
            pl.BlockSpec((rows, H2), lambda i: (0, 0)),        # slab stays VMEM-resident
        ],
        out_specs=pl.BlockSpec((tile_b, OUT_PAD), lambda i: (i, 0)),
        compiler_params=pltpu.CompilerParams(
            dimension_semantics=("parallel",)),                # megacore / v7x 2nd TC
        cost_estimate=pl.CostEstimate(
            flops=flops, transcendentals=2 * b_pad * H2,
            bytes_accessed=bytes_accessed),
    )(x, packed["slab"])

    action_mean = out[:B, :A]
    state_value = out[:B, A:A + 1]
    return action_mean, packed["sigma"], state_value


# --------------------------- parameter init ----------------------------------
def init_policy_params(key, state_space, action_space, hidden=128):
    """Mirrors Policy.__init__: xavier_normal_ weights, zero biases, sigma=0.5.
    Weights stored as [in, out] (transposed vs torch Linear's [out, in])."""

    def xavier_normal(k, fan_in, fan_out):
        std = (2.0 / (fan_in + fan_out)) ** 0.5
        return std * jax.random.normal(k, (fan_in, fan_out), dtype=jnp.float32)

    ks = jax.random.split(key, 6)
    return {
        # Actor
        "w1a": xavier_normal(ks[0], state_space, hidden),
        "b1a": jnp.zeros((1, hidden), jnp.float32),
        "w2a": xavier_normal(ks[1], hidden, hidden),
        "b2a": jnp.zeros((1, hidden), jnp.float32),
        "w3a": xavier_normal(ks[2], hidden, action_space),
        "b3a": jnp.zeros((1, action_space), jnp.float32),
        "sigma": jnp.full((1, action_space), 0.5, jnp.float32),
        # Critic
        "w1c": xavier_normal(ks[3], state_space, hidden),
        "b1c": jnp.zeros((1, hidden), jnp.float32),
        "w2c": xavier_normal(ks[4], hidden, hidden),
        "b2c": jnp.zeros((1, hidden), jnp.float32),
        "w3c": xavier_normal(ks[5], hidden, 1),
        "b3c": jnp.zeros((1, 1), jnp.float32),
    }


# --------------------------- pure-JAX reference -------------------------------
def policy_forward_ref(x, p):
    h = jnp.tanh(x @ p["w1a"] + p["b1a"])
    h = jnp.tanh(h @ p["w2a"] + p["b2a"])
    mean = h @ p["w3a"] + p["b3a"]
    sigma = jax.nn.softplus(p["sigma"])
    c = jnp.tanh(x @ p["w1c"] + p["b1c"])
    c = jnp.tanh(c @ p["w2c"] + p["b2c"])
    value = c @ p["w3c"] + p["b3c"]
    return mean, sigma, value


if __name__ == "__main__":
    STATE_SPACE = 16   # observation dim
    ACTION_SPACE = 4   # action dim
    BATCH = 8

    key = jax.random.PRNGKey(0)
    k_param, k_x = jax.random.split(key)

    params = init_policy_params(k_param, STATE_SPACE, ACTION_SPACE)
    packed = pack_policy_params(params)          # once per parameter set
    x = jax.random.normal(k_x, (BATCH, STATE_SPACE), dtype=jnp.float32)

    mean, sigma, value = jax.block_until_ready(policy_forward(x, packed))

    # sanity-check against plain-JAX f32 reference (bf16 weights -> looser tol)
    mean_r, sigma_r, value_r = policy_forward_ref(x, params)
    assert mean.shape == (BATCH, ACTION_SPACE) and value.shape == (BATCH, 1)
    assert jnp.allclose(mean, mean_r, atol=5e-2, rtol=5e-2), "actor mean mismatch"
    assert jnp.allclose(sigma, sigma_r, atol=1e-6), "sigma mismatch"
    assert jnp.allclose(value, value_r, atol=5e-2, rtol=5e-2), "critic value mismatch"

    print("KERNEL_OK")
</pallas_src>

<mosaic_0001>
module attributes {stable_mosaic.version = 11 : i64} {
  func.func @_policy_kernel(%arg0: i32, %arg1: memref<16x16xbf16, #tpu.memory_space<vmem>>, %arg2: memref<448x256xbf16, #tpu.memory_space<vmem>>, %arg3: memref<16x128xf32, #tpu.memory_space<vmem>>) attributes {dimension_semantics = [#tpu.dimension_semantics<parallel>], iteration_bounds = array<i64: 1>, scalar_prefetch = 0 : i64, scratch_operands = 0 : i64, tpu.core_type = #tpu.core_type<tc>, window_params = [{transform_indices = @transform_0, window_bounds = array<i64: 16, 16>}, {pipeline_mode = #tpu.pipeline_mode<synchronous>, transform_indices = @transform_1, window_bounds = array<i64: 448, 256>}, {transform_indices = @transform_2, window_bounds = array<i64: 16, 128>}]} {
    %c0 = arith.constant 0 : index
    %c0_0 = arith.constant 0 : index
    %0 = vector.load %arg1[%c0, %c0_0] : memref<16x16xbf16, #tpu.memory_space<vmem>>, vector<16x16xbf16>
    %c0_1 = arith.constant 0 : index
    %c0_2 = arith.constant 0 : index
    %1 = vector.load %arg2[%c0_1, %c0_2] : memref<448x256xbf16, #tpu.memory_space<vmem>>, vector<16x256xbf16>
    %c16 = arith.constant 16 : index
    %c0_3 = arith.constant 0 : index
    %2 = vector.load %arg2[%c16, %c0_3] : memref<448x256xbf16, #tpu.memory_space<vmem>>, vector<1x256xbf16>
    %3 = arith.extf %2 : vector<1x256xbf16> to vector<1x256xf32>
    %cst = arith.constant dense<0.000000e+00> : vector<16x256xf32>
    %4 = tpu.matmul %0, %1, %cst {dimension_numbers = #tpu.dot_dimension_numbers<[1], [0], [0], [1], [0, 0, 1, 1], [], []>} : vector<16x16xbf16>, vector<16x256xbf16>, vector<16x256xf32> -> vector<16x256xf32>
    %5 = vector.broadcast %3 : vector<1x256xf32> to vector<16x256xf32>
    %6 = arith.addf %4, %5 : vector<16x256xf32>
    %7 = math.tanh %6 : vector<16x256xf32>
    %8 = arith.truncf %7 : vector<16x256xf32> to vector<16x256xbf16>
    %c32 = arith.constant 32 : index
    %c0_4 = arith.constant 0 : index
    %9 = vector.load %arg2[%c32, %c0_4] : memref<448x256xbf16, #tpu.memory_space<vmem>>, vector<256x256xbf16>
    %c288 = arith.constant 288 : index
    %c0_5 = arith.constant 0 : index
    %10 = vector.load %arg2[%c288, %c0_5] : memref<448x256xbf16, #tpu.memory_space<vmem>>, vector<1x256xbf16>
    %11 = arith.extf %10 : vector<1x256xbf16> to vector<1x256xf32>
    %cst_6 = arith.constant dense<0.000000e+00> : vector<16x256xf32>
    %12 = tpu.matmul %8, %9, %cst_6 {dimension_numbers = #tpu.dot_dimension_numbers<[1], [0], [0], [1], [0, 0, 1, 1], [], []>} : vector<16x256xbf16>, vector<256x256xbf16>, vector<16x256xf32> -> vector<16x256xf32>
    %13 = vector.broadcast %11 : vector<1x256xf32> to vector<16x256xf32>
    %14 = arith.addf %12, %13 : vector<16x256xf32>
    %15 = math.tanh %14 : vector<16x256xf32>
    %16 = arith.truncf %15 : vector<16x256xf32> to vector<16x256xbf16>
    %c304 = arith.constant 304 : index
    %c0_7 = arith.constant 0 : index
    %17 = vector.load %arg2[%c304, %c0_7] : memref<448x256xbf16, #tpu.memory_space<vmem>>, vector<128x128xbf16>
    %c304_8 = arith.constant 304 : index
    %c128 = arith.constant 128 : index
    %18 = vector.load %arg2[%c304_8, %c128] : memref<448x256xbf16, #tpu.memory_space<vmem>>, vector<128x128xbf16>
    %c432 = arith.constant 432 : index
    %c0_9 = arith.constant 0 : index
    %19 = vector.load %arg2[%c432, %c0_9] : memref<448x256xbf16, #tpu.memory_space<vmem>>, vector<1x128xbf16>
    %20 = arith.extf %19 : vector<1x128xbf16> to vector<1x128xf32>
    %21 = vector.extract_strided_slice %16 {offsets = [0, 0], sizes = [16, 128], strides = [1, 1]} : vector<16x256xbf16> to vector<16x128xbf16>
    %cst_10 = arith.constant dense<0.000000e+00> : vector<16x128xf32>
    %22 = tpu.matmul %21, %17, %cst_10 {dimension_numbers = #tpu.dot_dimension_numbers<[1], [0], [0], [1], [0, 0, 1, 1], [], []>} : vector<16x128xbf16>, vector<128x128xbf16>, vector<16x128xf32> -> vector<16x128xf32>
    %23 = vector.extract_strided_slice %16 {offsets = [0, 128], sizes = [16, 128], strides = [1, 1]} : vector<16x256xbf16> to vector<16x128xbf16>
    %cst_11 = arith.constant dense<0.000000e+00> : vector<16x128xf32>
    %24 = tpu.matmul %23, %18, %cst_11 {dimension_numbers = #tpu.dot_dimension_numbers<[1], [0], [0], [1], [0, 0, 1, 1], [], []>} : vector<16x128xbf16>, vector<128x128xbf16>, vector<16x128xf32> -> vector<16x128xf32>
    %25 = arith.addf %22, %24 : vector<16x128xf32>
    %26 = vector.broadcast %20 : vector<1x128xf32> to vector<16x128xf32>
    %27 = arith.addf %25, %26 : vector<16x128xf32>
    %c0_12 = arith.constant 0 : index
    %c0_13 = arith.constant 0 : index
    %28 = vector.load %arg3[%c0_12, %c0_13] : memref<16x128xf32, #tpu.memory_space<vmem>>, vector<16x128xf32>
    tpu.vector_store %arg3[%c0_12, %c0_13], %27 {strides = array<i32>} : memref<16x128xf32, #tpu.memory_space<vmem>>, vector<16x128xf32>,
    return
  }
  func.func @transform_0(%arg0: i32) -> (i32, i32) {
    %c0_i32 = arith.constant 0 : i32
    %c0_i32_0 = arith.constant 0 : i32
    return %arg0, %c0_i32 : i32, i32
  }
  func.func @transform_1(%arg0: i32) -> (i32, i32) {
    %c0_i32 = arith.constant 0 : i32
    %c0_i32_0 = arith.constant 0 : i32
    %c0_i32_1 = arith.constant 0 : i32
    return %c0_i32, %c0_i32_0 : i32, i32
  }
  func.func @transform_2(%arg0: i32) -> (i32, i32) {
    %c0_i32 = arith.constant 0 : i32
    %c0_i32_0 = arith.constant 0 : i32
    return %arg0, %c0_i32 : i32, i32
  }
}

</mosaic_0001>

<bundles_post_ra>
// kernel: tpu_custom_call.1
= control target key start
LH: loop header
LB: loop body
LE: loop exit
PB: predicated region body
PF: predicated region fallthrough
CT: control target
= control target key end

     0   :  { %7 = vsyncpa [#allocation3], 0  ;;  %s951_s0 = inlined_call_operand.hbm [shape: bf16[16,16], index: 0, kind: input, shape index: {}]   ;;  %s952_s1 = inlined_call_operand.hbm [shape: bf16[448,256], index: 1, kind: input, shape index: {}]   ;;  %s953_s2 = inlined_call_operand.hbm [shape: f32[16,128], index: 2, kind: output, shape index: {}]  }
   0x1   :  { %8 = vsyncpa [#allocation6], 0 }
   0x2   :  { %9 = vsyncpa [#allocation4], 0  ;;  %s884_s9 = smov [#allocation2]  }
   0x3   :  { %s15_s10 = sshll.u32 %s884_s9, 4  ;;  %s16_s10 = int_to_ptr.vmem [resolvable:$true] %s15_s10 }
   0x4   :  { %s826_s11 = scalar_lea.vmem %s16_s10, 128  ;;  %p831_p1 = scmp.lt.s32.totalorder %s16_s10, %s16_s10 }
   0x5   :  { %p827_p0 = scmp.ne.s32.totalorder %s16_s10, %s826_s11  ;;  %p832_p2 = scmp.lt.s32.totalorder %s826_s11, %s826_s11 }
   0x7   :  { %p833_p3 = por %p832_p2, %p831_p1 }
   0x9   :  { %p834_p4 = pnand %p833_p3, %p827_p0 }
   0xb   :  { %837 = shalt.err (!%p834_p4)
}
   0xc   :  { %s885_s12 = smov 64   ;;  %s886_s13 = smov 4  }
   0xd   :  { %21 = dma.hbm_to_vmem [thread:$0]  %s951_s0, 128, %s16_s10, [#allocation3], %s885_s12, %s885_s12, %s886_s13  }
   0xe   :  { %s887_s16 = smov [#allocation5]  }
   0xf   :  { %s27_s17 = sshll.u32 %s887_s16, 4  ;;  %s28_s17 = int_to_ptr.vmem [resolvable:$true] %s27_s17 }
  0x10   :  { %s846_s18 = scalar_lea.vmem %s28_s17, 7168  ;;  %p851_p6 = scmp.lt.s32.totalorder %s28_s17, %s28_s17 }
  0x11   :  { %p847_p5 = scmp.ne.s32.totalorder %s28_s17, %s846_s18  ;;  %p852_p7 = scmp.lt.s32.totalorder %s846_s18, %s846_s18 }
  0x13   :  { %p853_p8 = por %p852_p7, %p851_p6 }
  0x15   :  { %p854_p9 = pnand %p853_p8, %p847_p5 }
  0x17   :  { %857 = shalt.err (!%p854_p9)
}
  0x18   :  { %s888_s19 = smov 128   ;;  %s889_s20 = smov 8  }
  0x19   :  { %33 = dma.hbm_to_vmem [thread:$0]  %s952_s1, 7168, %s28_s17, [#allocation6], %s888_s19, %s888_s19, %s889_s20  }
  0x1a   :  { %878 = dma.done.wait [#allocation3], 128  }
  0x1b   :  { %879 = vsyncadd [#allocation3], 4294967168 }
  0x1c   :  { %880 = dma.done.wait [#allocation6], 7168  }
  0x1d   :  { %881 = vsyncadd [#allocation6], 4294960128  ;;  %v890_v0 = vmov 0   ;;  %v734_v1 = vld [vmem:[#allocation5 + $0x4] ss:$8 sps:$4 sm:$0xff]   ;;  %v737_v3 = vld [vmem:[#allocation2] sm:$0xff]   ;;  %v48_v39 = vlaneseq }
  0x1e   :  { %107 = vmatprep.mubr.bf16.mxu0 %v890_v0  ;;  %v736_v2 = vld [vmem:[#allocation5] ss:$8 sps:$4 sm:$0xff]   ;;  %89 = vmatprep.subr.bf16.mxu0 %v734_v1  ;;  %vm71_vm0 = vcmask 130048   ;;  %v738_v4 = vld [vmem:[#allocation5 + $0x94] ss:$8 sps:$4 sm:$0xff]   ;;  %v891_v37 = vmov 0.0  }
  0x1f   :  { %90 = vmatpush1.bf16.msra.mxu0 %v736_v2  ;;  %v740_v5 = vld [vmem:[#allocation5 + $0x90] ss:$8 sps:$4 sm:$0xff]   ;;  %v741_v6 = vld [vmem:[#allocation5 + $0x84] ss:$8 sps:$4 sm:$0xff]   ;;  %327 = vmatprep.subr.bf16.mxu1 %v738_v4  ;;  %v743_v7 = vld [vmem:[#allocation5 + $0x80] ss:$8 sps:$4 sm:$0xff]  }
  0x20   :  { %328 = vmatpush1.bf16.msra.mxu1 %v740_v5  ;;  %v744_v8 = vld [vmem:[#allocation5 + $0x74] ss:$8 sps:$4 sm:$0xff]   ;;  %v746_v9 = vld [vmem:[#allocation5 + $0x70] ss:$8 sps:$4 sm:$0xff]   ;;  %v747_v10 = vld [vmem:[#allocation5 + $0x64] ss:$8 sps:$4 sm:$0xff]   ;;  %684 = vmatprep.subr.bf16.mxu0 %v891_v37 }
  0x21   :  { %329 = vmatprep.subr.bf16.mxu1 %v741_v6  ;;  %v749_v11 = vld [vmem:[#allocation5 + $0x60] ss:$8 sps:$4 sm:$0xff]   ;;  %v750_v12 = vld [vmem:[#allocation5 + $0x54] ss:$8 sps:$4 sm:$0xff]   ;;  %v752_v13 = vld [vmem:[#allocation5 + $0x50] ss:$8 sps:$4 sm:$0xff]  }
  0x22   :  { %617 = vmatmul.mubr.msk.bf16.vlgmr.msra.gmra.mxu0 %vm71_vm0, %v737_v3  ;;  %v753_v14 = vld [vmem:[#allocation5 + $0x44] ss:$8 sps:$4 sm:$0xff]   ;;  %v755_v15 = vld [vmem:[#allocation5 + $0x40] ss:$8 sps:$4 sm:$0xff]   ;;  %v756_v16 = vld [vmem:[#allocation5 + $0x34] ss:$8 sps:$4 sm:$0xff]  }
  0x23   :  { %v758_v17 = vld [vmem:[#allocation5 + $0x30] ss:$8 sps:$4 sm:$0xff]   ;;  %v759_v18 = vld [vmem:[#allocation5 + $0x24] ss:$8 sps:$4 sm:$0xff]   ;;  %v761_v19 = vld [vmem:[#allocation5 + $0x20] ss:$8 sps:$4 sm:$0xff]  }
  0x24   :  { %330 = vmatpush1.bf16.msra.mxu1 %v743_v7  ;;  %v762_v20 = vld [vmem:[#allocation5 + $0x114] ss:$8 sps:$4 sm:$0xff]   ;;  %v764_v21 = vld [vmem:[#allocation5 + $0x110] ss:$8 sps:$4 sm:$0xff]   ;;  %v765_v22 = vld [vmem:[#allocation5 + $0x104] ss:$8 sps:$4 sm:$0xff]  }
  0x25   :  { %331 = vmatprep.subr.bf16.mxu1 %v744_v8  ;;  %v767_v23 = vld [vmem:[#allocation5 + $0x100] ss:$8 sps:$4 sm:$0xff]   ;;  %v768_v24 = vld [vmem:[#allocation5 + $0xf4] ss:$8 sps:$4 sm:$0xff]   ;;  %v770_v25 = vld [vmem:[#allocation5 + $0xf0] ss:$8 sps:$4 sm:$0xff]  }
  0x26   :  { %v771_v26 = vld [vmem:[#allocation5 + $0xe4] ss:$8 sps:$4 sm:$0xff]   ;;  %v773_v27 = vld [vmem:[#allocation5 + $0xe0] ss:$8 sps:$4 sm:$0xff]   ;;  %v774_v28 = vld [vmem:[#allocation5 + $0xd4] ss:$8 sps:$4 sm:$0xff]  }
  0x27   :  { %v776_v29 = vld [vmem:[#allocation5 + $0xd0] ss:$8 sps:$4 sm:$0xff]   ;;  %v777_v30 = vld [vmem:[#allocation5 + $0xc4] ss:$8 sps:$4 sm:$0xff]   ;;  %v779_v31 = vld [vmem:[#allocation5 + $0xc0] ss:$8 sps:$4 sm:$0xff]  }
  0x28   :  { %332 = vmatpush1.bf16.msra.mxu1 %v746_v9  ;;  %v780_v32 = vld [vmem:[#allocation5 + $0xb4] ss:$8 sps:$4 sm:$0xff]   ;;  %v782_v33 = vld [vmem:[#allocation5 + $0xb0] ss:$8 sps:$4 sm:$0xff]   ;;  %v783_v34 = vld [vmem:[#allocation5 + $0xa4] ss:$8 sps:$4 sm:$0xff]  }
  0x29   :  { %333 = vmatprep.subr.bf16.mxu1 %v747_v10  ;;  %v785_v35 = vld [vmem:[#allocation5 + $0xa0] ss:$8 sps:$4 sm:$0xff]   ;;  %v786_v36 = vld [vmem:[#allocation5 + $0x1a4] ss:$8 sps:$4 sm:$0xff]   ;;  %v787_v38 = vld [vmem:[#allocation5 + $0x194] ss:$8 sps:$4 sm:$0xff]  }
  0x2a   :  { %685 = vmatpush3.bf16.msra.mxu0 %v786_v36  ;;  %v49_v40 = vshrl.u32 %v48_v39, 7  ;;  %v45_v41 = vld [vmem:[#allocation5 + $0x10] sm:$0x11]  ;;  %v788_v61 = vld [vmem:[#allocation5 + $0x184] ss:$8 sps:$4 sm:$0xff]   ;;  %vm892_vm1 = vmmov 0  }
  0x2b   :  { %686 = vmatprep.subr.bf16.mxu0 %v891_v37  ;;  %v47_v42 = vunpack.c.h.bf16 %v45_v41  ;;  %v46_v44 = vunpack.c.l.bf16 %v45_v41  ;;  %v789_v62 = vld [vmem:[#allocation5 + $0x174] ss:$8 sps:$4 sm:$0xff]   ;;  %v790_v63 = vld [vmem:[#allocation5 + $0x164] ss:$8 sps:$4 sm:$0xff]   ;;  %700 = vmatprep.mubr.msk.bf16.mxu0 %vm892_vm1, %v891_v37  ;;  %s893_s0 = smov [#allocation7]  }
  0x2c   :  { %334 = vmatpush1.bf16.msra.mxu1 %v749_v11  ;;  %v921_v43 = vsub.s32 0, %v49_v40  ;;  %v791_v0 = vld [vmem:[#allocation5 + $0x154] ss:$8 sps:$4 sm:$0xff]   ;;  %v792_v1 = vld [vmem:[#allocation5 + $0x144] ss:$8 sps:$4 sm:$0xff]   ;;  %s601_s1 = sshll.u32 %s893_s0, 4  ;;  %s602_s1 = int_to_ptr.vmem [resolvable:$true] %s601_s1 }
  0x2d   :  { %335 = vmatprep.subr.bf16.mxu1 %v750_v12  ;;  %v793_v2 = vld [vmem:[#allocation5 + $0x134] ss:$8 sps:$4 sm:$0xff]   ;;  %v156_v3 = vld [vmem:[#allocation5 + $0x120] sm:$0x11]  ;;  %s858_s23 = scalar_lea.vmem %s602_s1, 256  ;;  %p863_p11 = scmp.lt.s32.totalorder %s602_s1, %s602_s1 }
  0x2e   :  { %687 = vmatpush3.bf16.msra.mxu0 %v787_v38  ;;  %v55_v45 = vrot.slane %v47_v42, %v921_v43  ;;  %v51_v47 = vrot.slane %v46_v44, %v921_v43  ;;  %v158_v4 = vunpack.c.h.bf16 %v156_v3  ;;  %p859_p10 = scmp.ne.s32.totalorder %s602_s1, %s858_s23  ;;  %p864_p12 = scmp.lt.s32.totalorder %s858_s23, %s858_s23 }
  0x2f   :  { %688 = vmatprep.subr.bf16.mxu0 %v891_v37 }
  0x30   :  { %336 = vmatpush1.bf16.msra.mxu1 %v752_v13  ;;  %v166_v6 = vrot.slane %v158_v4, %v921_v43  ;;  %p865_p13 = por %p864_p12, %p863_p11 }
  0x31   :  { %337 = vmatprep.subr.bf16.mxu1 %v753_v14  ;;  %v794_v14 = vld [vmem:[#allocation5 + $0x1a0] ss:$8 sps:$4 sm:$0xff]  }
  0x32   :  { %689 = vmatpush3.bf16.msra.mxu0 %v788_v61  ;;  %p866_p0 = pnand %p865_p13, %p859_p10 }
  0x33   :  { %690 = vmatprep.subr.bf16.mxu0 %v891_v37 }
  0x34   :  { %338 = vmatpush1.bf16.msra.mxu1 %v755_v15 }
  0x35   :  { %339 = vmatprep.subr.bf16.mxu1 %v756_v16  ;;  %v795_v16 = vld [vmem:[#allocation5 + $0x190] ss:$8 sps:$4 sm:$0xff]  }
  0x36   :  { %691 = vmatpush3.bf16.msra.mxu0 %v789_v62 }
  0x37   :  { %692 = vmatprep.subr.bf16.mxu0 %v891_v37 }
  0x38   :  { %340 = vmatpush1.bf16.msra.mxu1 %v758_v17  ;;  %v157_v17 = vunpack.c.l.bf16 %v156_v3 }
  0x39   :  { %341 = vmatprep.subr.bf16.mxu1 %v759_v18  ;;  %v796_v18 = vld [vmem:[#allocation5 + $0x180] ss:$8 sps:$4 sm:$0xff]  }
  0x3a   :  { %693 = vmatpush3.bf16.msra.mxu0 %v790_v63 }
  0x3b   :  { %694 = vmatprep.subr.bf16.mxu0 %v891_v37 }
  0x3c   :  { %342 = vmatpush1.bf16.msra.mxu1 %v761_v19  ;;  %v162_v19 = vrot.slane %v157_v17, %v921_v43 }
  0x3d   :  { %343 = vmatprep.subr.bf16.mxu1 %v762_v20  ;;  %v797_v20 = vld [vmem:[#allocation5 + $0x170] ss:$8 sps:$4 sm:$0xff]  }
  0x3e   :  { %695 = vmatpush3.bf16.msra.mxu0 %v791_v0 }
  0x3f   :  { %696 = vmatprep.subr.bf16.mxu0 %v891_v37 }
  0x40   :  { %344 = vmatpush2.bf16.msra.mxu1 %v764_v21 }
  0x41   :  { %345 = vmatprep.subr.bf16.mxu1 %v765_v22 }
  0x42   :  { %697 = vmatpush3.bf16.msra.mxu0 %v792_v1 }
  0x43   :  { %698 = vmatprep.subr.bf16.mxu0 %v891_v37 }
  0x44   :  { %346 = vmatpush2.bf16.msra.mxu1 %v767_v23  ;;  %v798_v23 = vld [vmem:[#allocation5 + $0x160] ss:$8 sps:$4 sm:$0xff]  }
  0x45   :  { %347 = vmatprep.subr.bf16.mxu1 %v768_v24  ;;  %v799_v24 = vld [vmem:[#allocation5 + $0x150] ss:$8 sps:$4 sm:$0xff]  }
  0x46   :  { %699 = vmatpush3.bf16.msra.mxu0 %v793_v2 }
  0x47   :  { %704 = vmatprep.subr.bf16.mxu0 %v891_v37 }
  0x48   :  { %348 = vmatpush2.bf16.msra.mxu1 %v770_v25  ;;  %v800_v25 = vld [vmem:[#allocation5 + $0x140] ss:$8 sps:$4 sm:$0xff]  }
  0x49   :  { %349 = vmatprep.subr.bf16.mxu1 %v771_v26  ;;  %v801_v26 = vld [vmem:[#allocation5 + $0x130] ss:$8 sps:$4 sm:$0xff]  }
  0x4c   :  { %350 = vmatpush2.bf16.msra.mxu1 %v773_v27 }
  0x4d   :  { %351 = vmatprep.subr.bf16.mxu1 %v774_v28 }
  0x50   :  { %352 = vmatpush2.bf16.msra.mxu1 %v776_v29 }
  0x51   :  { %353 = vmatprep.subr.bf16.mxu1 %v777_v30 }
  0x54   :  { %354 = vmatpush2.bf16.msra.mxu1 %v779_v31 }
  0x55   :  { %355 = vmatprep.subr.bf16.mxu1 %v780_v32 }
  0x58   :  { %356 = vmatpush2.bf16.msra.mxu1 %v782_v33 }
  0x59   :  { %357 = vmatprep.subr.bf16.mxu1 %v783_v34  ;;  %v408_v34 = vld [vmem:[#allocation5 + $0x1b0] sm:$0x1] }
  0x5c   :  { %358 = vmatpush2.bf16.msra.mxu1 %v785_v35  ;;  %v409_v35 = vunpack.c.l.bf16 %v408_v34 }
  0x5e   :  { %v591_v36 = vrot.slane %v409_v35, %v921_v43 }
  0xe2   :  { %v109_v46 = vpop.f32.mrf.mxu0 }
  0xe3   :  { %v110_v52 = vadd.f32 %v109_v46, %v51_v47 }
  0xe4   :  { %v111_v48 = vpop.f32.mrf.mxu0 }
  0xe5   :  { %v112_v49 = vadd.f32 %v111_v48, %v55_v45 }
  0xe6   :  { %v113_v50 = vpop.f32.mrf.mxu0 }
  0xe7   :  { %v114_v51 = vadd.f32 %v113_v50, %v51_v47  ;;  %802 = vtanh.f32 %v112_v49 }
  0xe8   :  { %v115_v53 = vpop.f32.mrf.mxu0 }
  0xe9   :  { %v116_v54 = vadd.f32 %v115_v53, %v55_v45  ;;  %804 = vtanh.f32 %v114_v51 }
  0xeb   :  { %806 = vtanh.f32 %v116_v54 }
  0xec   :  { %808 = vtanh.f32 %v110_v52 }
  0xf4   :  { %v803_v55 = vpop.eup %802 }
  0xf6   :  { %v805_v56 = vpop.eup %804 }
  0xf8   :  { %v807_v57 = vpop.eup %806 }
  0xf9   :  { %v809_v58 = vpop.eup %808  ;;  %v123_v59 = vpack.c.bf16 %v807_v57, %v803_v55 }
  0xfa   :  { %v122_v60 = vpack.c.bf16 %v805_v56, %v809_v58 }
  0xfb   :  { %359 = vmatprep.mubr.bf16.mxu1 %v123_v59 }
  0xfc   :  { %360 = vmatmul.mubr.bf16.vlgmr.msra.gmra.mxu1 %v122_v60 }
 0x1bc   :  { %v361_v5 = vpop.f32.mrf.mxu1 }
 0x1bd   :  { %v362_v22 = vadd.f32 %v361_v5, %v162_v19 }
 0x1be   :  { %v363_v7 = vpop.f32.mrf.mxu1 }
 0x1bf   :  { %v364_v8 = vadd.f32 %v363_v7, %v166_v6 }
 0x1c0   :  { %v365_v9 = vpop.f32.mrf.mxu1 }
 0x1c1   :  { %810 = vtanh.f32 %v364_v8  ;;  %v366_v21 = vadd.f32 %v365_v9, %v162_v19 }
 0x1c2   :  { %v367_v10 = vpop.f32.mrf.mxu1 }
 0x1c3   :  { %v368_v11 = vadd.f32 %v367_v10, %v166_v6 }
 0x1c5   :  { %812 = vtanh.f32 %v368_v11 }
 0x1c6   :  { %814 = vtanh.f32 %v366_v21 }
 0x1c7   :  { %816 = vtanh.f32 %v362_v22 }
 0x1ce   :  { %v811_v12 = vpop.eup %810 }
 0x1d2   :  { %v813_v13 = vpop.eup %812 }
 0x1d3   :  { %v375_v15 = vpack.c.bf16 %v813_v13, %v811_v12  ;;  %v815_v27 = vpop.eup %814 }
 0x1d4   :  { %v817_v28 = vpop.eup %816 }
 0x1d5   :  { %701 = vmatmul.mubr.bf16.vlgmr.msra.gmra.mxu0 %v375_v15  ;;  %v374_v29 = vpack.c.bf16 %v815_v27, %v817_v28 }
 0x1d6   :  { %705 = vmatpush3.bf16.msra.mxu0 %v794_v14  ;;  %720 = vmatprep.mubr.msk.bf16.mxu0 %vm892_vm1, %v891_v37 }
 0x1d7   :  { %706 = vmatprep.subr.bf16.mxu0 %v891_v37 }
 0x1da   :  { %707 = vmatpush3.bf16.msra.mxu0 %v795_v16 }
 0x1db   :  { %708 = vmatprep.subr.bf16.mxu0 %v891_v37 }
 0x1de   :  { %709 = vmatpush3.bf16.msra.mxu0 %v796_v18 }
 0x1df   :  { %710 = vmatprep.subr.bf16.mxu0 %v891_v37 }
 0x1e2   :  { %711 = vmatpush3.bf16.msra.mxu0 %v797_v20 }
 0x1e3   :  { %712 = vmatprep.subr.bf16.mxu0 %v891_v37 }
 0x1e6   :  { %713 = vmatpush3.bf16.msra.mxu0 %v798_v23 }
 0x1e7   :  { %714 = vmatprep.subr.bf16.mxu0 %v891_v37 }
 0x1ea   :  { %715 = vmatpush3.bf16.msra.mxu0 %v799_v24 }
 0x1eb   :  { %716 = vmatprep.subr.bf16.mxu0 %v891_v37 }
 0x1ee   :  { %717 = vmatpush3.bf16.msra.mxu0 %v800_v25 }
 0x1ef   :  { %718 = vmatprep.subr.bf16.mxu0 %v891_v37 }
 0x1f2   :  { %719 = vmatpush3.bf16.msra.mxu0 %v801_v26 }
 0x1f5   :  { %721 = vmatmul.mubr.bf16.vlgmr.msra.gmra.mxu0 %v374_v29 }
 0x295   :  { %v492_v30 = vpop.f32.mrf.mxu0 }
 0x297   :  { %v702_v31 = vpop.f32.mrf.mxu0 }
 0x299   :  { %v495_v32 = vpop.f32.mrf.mxu0 }
 0x29b   :  { %v703_v33 = vpop.f32.mrf.mxu0 }
 0x2b5   :  { %v581_v38 = vpop.f32.mrf.mxu0 }
 0x2b6   :  { %v582_v39 = vadd.f32 %v581_v38, %v492_v30 }
 0x2b7   :  { %v722_v40 = vpop.f32.mrf.mxu0 }
 0x2b8   :  { %v592_v41 = vadd.f32 %v591_v36, %v582_v39 }
 0x2b9   :  { %v584_v42 = vpop.f32.mrf.mxu0 }
 0x2ba   :  { %594 = vst [vmem:[#allocation7] sm:$0xff] %v592_v41  ;;  %v585_v37 = vadd.f32 %v584_v42, %v495_v32 }
 0x2bb   :  { %v723_v44 = vpop.f32.mrf.mxu0 }
 0x2bc   :  { %v593_v45 = vadd.f32 %v591_v36, %v585_v37 }
 0x2be   :  { %595 = vst [vmem:[#allocation7 + $0x8] sm:$0xff] %v593_v45 }
 0x2bf   :  { %869 = shalt.err (!%p866_p0)
}
 0x2c0   :  { %607 = dma.vmem_to_hbm [thread:$0]  %s602_s1, 256, %s953_s2, [#allocation4], %s888_s19, %s888_s19, %s889_s20  }
 0x2c1   :  { %882 = dma.done.wait [#allocation4], 256  }
 0x2c2   :  { %883 = vsyncadd [#allocation4], 4294967040 }
 0x2c3   :  { %611 = vsyncpa [#allocation3], 1 }
 0x2c4   :  { %612 = vsyncpa [#allocation6], 1 }
 0x2c5   :  { %613 = vsyncpa [#allocation4], 1 }

</bundles_post_ra>
